<compile_context>
chip_gen: v5e
topology: v5e:2x2
jax: 0.10.0
libtpu: 0.0.40
codegen_flags: <defaults>
</compile_context>

<pallas_src>
from functools import partial

import jax
import jax.numpy as jnp
from jax.experimental import pallas as pl
from jax.experimental.pallas import tpu as pltpu

# ----------------------------- configuration -------------------------------
LORA_R = 8
LORA_ALPHA = 16
LORA_SCALE = LORA_ALPHA / LORA_R   # 2.0


def _round_up(x, m):
    return (x + m - 1) // m * m


def _pick_batch_tile(b):
    """Adaptive sublane-dense batch tile that avoids nearly-empty tail tiles."""
    b8 = _round_up(b, 8)
    if b8 <= 256:
        return b8                     # single tile, minimal padding
    # Large batches: 256-row tiles fill the 256-wide v6e/v7x MXU; fall back to
    # 128 when 256 would waste markedly more padding (v5e is already full at 128).
    waste256 = _round_up(b, 256) - b
    waste128 = _round_up(b, 128) - b
    return 128 if waste128 + 64 < waste256 else 256


def _pick_k_tile(d_in_pad):
    """Largest 128-multiple K tile (<=512) dividing the padded Din."""
    for t in (512, 256, 128):
        if d_in_pad % t == 0:
            return t
    return 128


# --------------------------------- kernel ----------------------------------
def _slinet_kernel(x_ref,       # VMEM [TB, TK]     f32   image tile (cast to bf16 here)
                   w_ref,       # VMEM [TK, D]      bf16  fused W_enc @ (W_out + s*A@B)
                   txt_ref,     # VMEM [D, Npad]    bf16  normalized text features, transposed
                   scale_ref,   # SMEM [1, 1]       f32   exp(logit_scale)
                   logits_ref,  # VMEM [TB, Npad]   f32   out: logits
                   feat_ref,    # VMEM [TB, D]      f32   out: normalized image features
                   acc_ref):    # VMEM [TB, D]      f32   scratch: feat accumulator
    k = pl.program_id(1)

    @pl.when(k == 0)
    def _():
        acc_ref[...] = jnp.zeros_like(acc_ref)

    # --- K-tiled image-feature GEMM (bf16 MXU, f32 accumulation) -----------
    x_bf = x_ref[...].astype(jnp.bfloat16)            # in-kernel cast (VPU, free under MXU)
    acc_ref[...] += jnp.dot(x_bf, w_ref[...], preferred_element_type=jnp.float32)

    @pl.when(k == pl.num_programs(1) - 1)
    def _():
        feat = acc_ref[...]
        # --- L2 normalize image features (dim=-1), f32 ---------------------
        ss = jnp.sum(feat * feat, axis=-1, keepdims=True)
        # eps guard only matters for all-zero (padding) rows; real rows unchanged.
        inv_norm = jax.lax.rsqrt(jnp.maximum(ss, 1e-12))
        feat_n = feat * inv_norm
        feat_ref[...] = feat_n
        # --- cosine logits; exp(logit_scale) applied in f32 on the output ---
        logits = jnp.dot(feat_n.astype(jnp.bfloat16), txt_ref[...],
                         preferred_element_type=jnp.float32)
        logits_ref[...] = scale_ref[0, 0] * logits


# ------------------------- one-time per-task prep ---------------------------
def prepare_slinet_params(w_enc, w_out, lora_a, lora_b, text_feat, logit_scale):
    """Hoisted per-task preprocessing (run ONCE per task, not per batch)."""
    d_in, d_emb = w_enc.shape
    n_cls = text_feat.shape[0]

    # LoRA delta folded into the base out_proj weight (inference).
    w_eff = w_out + LORA_SCALE * (lora_a @ lora_b)
    # Linear encoder path -> fold both GEMMs into one weight, once per task.
    # TODO(synk): keep W_enc / W_eff separate when real ViT nonlinear blocks exist.
    w_total = w_enc @ w_eff                                        # [Din, D]

    # Pad Din to a 128 multiple once (padded rows are zero) and cast to bf16.
    d_in_pad = _round_up(d_in, 128)
    w_total = jnp.pad(w_total, ((0, d_in_pad - d_in), (0, 0))).astype(jnp.bfloat16)

    # Constant text features: normalize, transpose, pad class axis lane-dense.
    t_n = text_feat / jnp.linalg.norm(text_feat, axis=-1, keepdims=True)
    n_pad = _round_up(n_cls, 128)
    txt = jnp.pad(t_n.T, ((0, 0), (0, n_pad - n_cls))).astype(jnp.bfloat16)

    # exp(logit_scale) stays f32 and is applied on the f32 logits in-kernel.
    scale = jnp.exp(logit_scale).astype(jnp.float32).reshape(1, 1)

    return {"w_total": w_total, "txt": txt, "scale": scale}, n_cls


# ------------------------------ per-batch forward ---------------------------
@partial(jax.jit, static_argnames=("n_cls",))
def slinet_lora_forward(image, w_total, txt, scale, *, n_cls):
    """image: NCHW [B, C, H, W] float32. Returns dict(logits, features)."""
    B = image.shape[0]
    d_in_pad, d_emb = w_total.shape
    n_pad = txt.shape[1]

    # Flatten only; no wrapper-side bf16 cast (done in-kernel under the MXU).
    x = image.reshape(B, -1).astype(jnp.float32)
    d_in = x.shape[1]

    tb = _pick_batch_tile(B)
    b_pad = _round_up(B, tb)
    tk = _pick_k_tile(d_in_pad)

    pad_b = b_pad - B
    pad_k = d_in_pad - d_in
    if pad_b or pad_k:
        x = jnp.pad(x, ((0, pad_b), (0, pad_k)))

    grid = (b_pad // tb, d_in_pad // tk)

    flops = 2 * b_pad * (d_in_pad * d_emb + d_emb * n_pad)
    bytes_accessed = (x.size * 4 + w_total.size * 2 + txt.size * 2 +
                      b_pad * n_pad * 4 + b_pad * d_emb * 4)
    # Rough per-step VMEM footprint (double-buffered); clamp to a budget safe
    # on all generations (<= 48 MiB, under v7x's 64 MiB physical VMEM).
    buf_bytes = (2 * tb * tk * 4 + 2 * tk * d_emb * 2 + 2 * d_emb * n_pad * 2 +
                 2 * tb * n_pad * 4 + 2 * tb * d_emb * 4 + tb * d_emb * 4)
    vmem_limit = min(48 * 1024 * 1024, max(32 * 1024 * 1024, 2 * buf_bytes))

    logits_p, feats_p = pl.pallas_call(
        _slinet_kernel,
        out_shape=(
            jax.ShapeDtypeStruct((b_pad, n_pad), jnp.float32),
            jax.ShapeDtypeStruct((b_pad, d_emb), jnp.float32),
        ),
        grid=grid,
        in_specs=[
            pl.BlockSpec((tb, tk), lambda i, k: (i, k)),         # x: batch+K tiled
            pl.BlockSpec((tk, d_emb), lambda i, k: (k, 0)),      # W_total: K tiled
            pl.BlockSpec((d_emb, n_pad), lambda i, k: (0, 0)),   # text: resident
            pl.BlockSpec(memory_space=pltpu.MemorySpace.SMEM),   # exp(logit_scale)
        ],
        out_specs=(
            pl.BlockSpec((tb, n_pad), lambda i, k: (i, 0)),
            pl.BlockSpec((tb, d_emb), lambda i, k: (i, 0)),
        ),
        scratch_shapes=[pltpu.VMEM((tb, d_emb), jnp.float32)],
        compiler_params=pltpu.CompilerParams(
            dimension_semantics=("parallel", "arbitrary"),
            vmem_limit_bytes=vmem_limit,
        ),
        cost_estimate=pl.CostEstimate(
            flops=flops, transcendentals=b_pad, bytes_accessed=bytes_accessed),
    )(x, w_total, txt, scale)

    return {"logits": logits_p[:B, :n_cls], "features": feats_p[:B, :]}


# --------------------------------- reference --------------------------------
def _reference(image, w_enc, w_out, lora_a, lora_b, text_feat, logit_scale):
    """Pure-JAX f32 reference matching SliNetLora.forward (numtask == 1)."""
    B = image.shape[0]
    x = image.reshape(B, -1)
    h = x @ w_enc
    feat = h @ w_out + LORA_SCALE * ((h @ lora_a) @ lora_b)
    feat_n = feat / jnp.linalg.norm(feat, axis=-1, keepdims=True)
    t_n = text_feat / jnp.linalg.norm(text_feat, axis=-1, keepdims=True)
    logits = jnp.exp(logit_scale) * (feat_n @ t_n.T)
    return logits, feat_n


if __name__ == "__main__":
    # Small, CLIP-like shapes.
    B, C, H, W = 2, 4, 16, 16          # image  -> D_in = 1024
    D_EMB = 128                        # embedding dim
    N_CLS = 50                         # core50 -> class_num = 50

    key = jax.random.PRNGKey(0)
    k = jax.random.split(key, 6)

    image = jax.random.normal(k[0], (B, C, H, W), dtype=jnp.float32)
    d_in = C * H * W

    w_enc = jax.random.normal(k[1], (d_in, D_EMB), jnp.float32) * (d_in ** -0.5)
    w_out = jax.random.normal(k[2], (D_EMB, D_EMB), jnp.float32) * (D_EMB ** -0.5)
    lora_a = jax.random.normal(k[3], (D_EMB, LORA_R), jnp.float32) * (D_EMB ** -0.5)
    lora_b = jax.random.normal(k[4], (LORA_R, D_EMB), jnp.float32) * 0.01
    text_feat = jax.random.normal(k[5], (N_CLS, D_EMB), jnp.float32)
    logit_scale = jnp.float32(jnp.log(1.0 / 0.07))   # CLIP init of logit_scale

    # One-time per-task preprocessing (hoisted out of the per-batch forward).
    params, n_cls = prepare_slinet_params(w_enc, w_out, lora_a, lora_b,
                                          text_feat, logit_scale)
    jax.block_until_ready(params)

    out = slinet_lora_forward(image, params["w_total"], params["txt"],
                              params["scale"], n_cls=n_cls)
    jax.block_until_ready(out)

    ref_logits, ref_feat = _reference(image, w_enc, w_out, lora_a, lora_b,
                                      text_feat, logit_scale)
    assert out["logits"].shape == (B, N_CLS)
    assert out["features"].shape == (B, D_EMB)
    # bf16 matmul inputs (f32 accumulation, f32 logit_scale applied post-matmul).
    assert jnp.allclose(out["logits"], ref_logits, atol=0.08, rtol=0.05)
    assert jnp.allclose(out["features"], ref_feat, atol=0.02, rtol=0.05)

    print("KERNEL_OK")
</pallas_src>

<mosaic_0001>
module attributes {stable_mosaic.version = 11 : i64} {
  func.func @_slinet_kernel(%arg0: i32, %arg1: i32, %arg2: memref<8x512xf32, #tpu.memory_space<vmem>>, %arg3: memref<512x128xbf16, #tpu.memory_space<vmem>>, %arg4: memref<128x128xbf16, #tpu.memory_space<vmem>>, %arg5: memref<1x1xf32, #tpu.memory_space<smem>>, %arg6: memref<8x128xf32, #tpu.memory_space<vmem>>, %arg7: memref<8x128xf32, #tpu.memory_space<vmem>>, %arg8: memref<8x128xf32, #tpu.memory_space<vmem>>) attributes {dimension_semantics = [#tpu.dimension_semantics<parallel>, #tpu.dimension_semantics<arbitrary>], iteration_bounds = array<i64: 1, 2>, scalar_prefetch = 0 : i64, scratch_operands = 1 : i64, tpu.core_type = #tpu.core_type<tc>, window_params = [{transform_indices = @transform_0, window_bounds = array<i64: 8, 512>}, {transform_indices = @transform_1, window_bounds = array<i64: 512, 128>}, {pipeline_mode = #tpu.pipeline_mode<synchronous>, transform_indices = @transform_2, window_bounds = array<i64: 128, 128>}, {transform_indices = @transform_3, window_bounds = array<i64: 1, 1>}, {transform_indices = @transform_4, window_bounds = array<i64: 8, 128>}, {transform_indices = @transform_5, window_bounds = array<i64: 8, 128>}]} {
    %c0_i32 = arith.constant 0 : i32
    %0 = arith.cmpi eq, %arg1, %c0_i32 : i32
    %1 = arith.extui %0 : i1 to i32
    %c0_i32_0 = arith.constant 0 : i32
    %2 = arith.cmpi ne, %1, %c0_i32_0 : i32
    scf.if %2 {
      %cst_9 = arith.constant 0.000000e+00 : f32
      %13 = vector.broadcast %cst_9 : f32 to vector<8x128xf32>
      %c0_10 = arith.constant 0 : index
      %c0_11 = arith.constant 0 : index
      %14 = vector.load %arg8[%c0_10, %c0_11] : memref<8x128xf32, #tpu.memory_space<vmem>>, vector<8x128xf32>
      tpu.vector_store %arg8[%c0_10, %c0_11], %13 {strides = array<i32>} : memref<8x128xf32, #tpu.memory_space<vmem>>, vector<8x128xf32>,
    } else {
    }
    %c0 = arith.constant 0 : index
    %c0_1 = arith.constant 0 : index
    %3 = vector.load %arg2[%c0, %c0_1] : memref<8x512xf32, #tpu.memory_space<vmem>>, vector<8x512xf32>
    %4 = arith.truncf %3 : vector<8x512xf32> to vector<8x512xbf16>
    %c0_2 = arith.constant 0 : index
    %c0_3 = arith.constant 0 : index
    %5 = vector.load %arg8[%c0_2, %c0_3] : memref<8x128xf32, #tpu.memory_space<vmem>>, vector<8x128xf32>
    %c0_4 = arith.constant 0 : index
    %c0_5 = arith.constant 0 : index
    %6 = vector.load %arg3[%c0_4, %c0_5] : memref<512x128xbf16, #tpu.memory_space<vmem>>, vector<512x128xbf16>
    %cst = arith.constant dense<0.000000e+00> : vector<8x128xf32>
    %7 = tpu.matmul %4, %6, %cst {dimension_numbers = #tpu.dot_dimension_numbers<[1], [0], [0], [1], [0, 0, 1, 1], [], []>} : vector<8x512xbf16>, vector<512x128xbf16>, vector<8x128xf32> -> vector<8x128xf32>
    %8 = arith.addf %5, %7 : vector<8x128xf32>
    %c0_6 = arith.constant 0 : index
    %c0_7 = arith.constant 0 : index
    %9 = vector.load %arg8[%c0_6, %c0_7] : memref<8x128xf32, #tpu.memory_space<vmem>>, vector<8x128xf32>
    tpu.vector_store %arg8[%c0_6, %c0_7], %8 {strides = array<i32>} : memref<8x128xf32, #tpu.memory_space<vmem>>, vector<8x128xf32>,
    %c1_i32 = arith.constant 1 : i32
    %10 = arith.cmpi eq, %arg1, %c1_i32 : i32
    %11 = arith.extui %10 : i1 to i32
    %c0_i32_8 = arith.constant 0 : i32
    %12 = arith.cmpi ne, %11, %c0_i32_8 : i32
    scf.if %12 {
      %c0_9 = arith.constant 0 : index
      %c0_10 = arith.constant 0 : index
      %13 = vector.load %arg8[%c0_9, %c0_10] : memref<8x128xf32, #tpu.memory_space<vmem>>, vector<8x128xf32>
      %14 = arith.mulf %13, %13 : vector<8x128xf32>
      %cst_11 = arith.constant dense<0.000000e+00> : vector<8xf32>
      %15 = vector.multi_reduction <add>, %14, %cst_11 [1] : vector<8x128xf32> to vector<8xf32>
      %16 = vector.shape_cast %15 : vector<8xf32> to vector<8x1xf32>
      %cst_12 = arith.constant 9.99999996E-13 : f32
      %17 = vector.broadcast %cst_12 : f32 to vector<8x1xf32>
      %18 = arith.maximumf %16, %17 : vector<8x1xf32>
      %19 = math.rsqrt %18 : vector<8x1xf32>
      %20 = vector.broadcast %19 : vector<8x1xf32> to vector<8x128xf32>
      %21 = arith.mulf %13, %20 : vector<8x128xf32>
      %c0_13 = arith.constant 0 : index
      %c0_14 = arith.constant 0 : index
      %22 = vector.load %arg7[%c0_13, %c0_14] : memref<8x128xf32, #tpu.memory_space<vmem>>, vector<8x128xf32>
      tpu.vector_store %arg7[%c0_13, %c0_14], %21 {strides = array<i32>} : memref<8x128xf32, #tpu.memory_space<vmem>>, vector<8x128xf32>,
      %23 = arith.truncf %21 : vector<8x128xf32> to vector<8x128xbf16>
      %c0_15 = arith.constant 0 : index
      %c0_16 = arith.constant 0 : index
      %24 = vector.load %arg4[%c0_15, %c0_16] : memref<128x128xbf16, #tpu.memory_space<vmem>>, vector<128x128xbf16>
      %cst_17 = arith.constant dense<0.000000e+00> : vector<8x128xf32>
      %25 = tpu.matmul %23, %24, %cst_17 {dimension_numbers = #tpu.dot_dimension_numbers<[1], [0], [0], [1], [0, 0, 1, 1], [], []>} : vector<8x128xbf16>, vector<128x128xbf16>, vector<8x128xf32> -> vector<8x128xf32>
      %c0_18 = arith.constant 0 : index
      %c0_19 = arith.constant 0 : index
      %26 = memref.load %arg5[%c0_18, %c0_19] : memref<1x1xf32, #tpu.memory_space<smem>>
      %27 = vector.broadcast %26 : f32 to vector<8x128xf32>
      %28 = arith.mulf %27, %25 : vector<8x128xf32>
      %c0_20 = arith.constant 0 : index
      %c0_21 = arith.constant 0 : index
      %29 = vector.load %arg6[%c0_20, %c0_21] : memref<8x128xf32, #tpu.memory_space<vmem>>, vector<8x128xf32>
      tpu.vector_store %arg6[%c0_20, %c0_21], %28 {strides = array<i32>} : memref<8x128xf32, #tpu.memory_space<vmem>>, vector<8x128xf32>,
    } else {
    }
    return
  }
  func.func @transform_0(%arg0: i32, %arg1: i32) -> (i32, i32) {
    %c0_i32 = arith.constant 0 : i32
    return %arg0, %arg1 : i32, i32
  }
  func.func @transform_1(%arg0: i32, %arg1: i32) -> (i32, i32) {
    %c0_i32 = arith.constant 0 : i32
    %c0_i32_0 = arith.constant 0 : i32
    return %arg1, %c0_i32 : i32, i32
  }
  func.func @transform_2(%arg0: i32, %arg1: i32) -> (i32, i32) {
    %c0_i32 = arith.constant 0 : i32
    %c0_i32_0 = arith.constant 0 : i32
    %c0_i32_1 = arith.constant 0 : i32
    return %c0_i32, %c0_i32_0 : i32, i32
  }
  func.func @transform_3(%arg0: i32, %arg1: i32) -> (i32, i32) {
    %c0_i32 = arith.constant 0 : i32
    %c0_i32_0 = arith.constant 0 : i32
    %c0_i32_1 = arith.constant 0 : i32
    return %c0_i32, %c0_i32_0 : i32, i32
  }
  func.func @transform_4(%arg0: i32, %arg1: i32) -> (i32, i32) {
    %c0_i32 = arith.constant 0 : i32
    %c0_i32_0 = arith.constant 0 : i32
    return %arg0, %c0_i32 : i32, i32
  }
  func.func @transform_5(%arg0: i32, %arg1: i32) -> (i32, i32) {
    %c0_i32 = arith.constant 0 : i32
    %c0_i32_0 = arith.constant 0 : i32
    return %arg0, %c0_i32 : i32, i32
  }
}

</mosaic_0001>

<bundles_post_ra>
// kernel: slinet_lora_forward.1
= control target key start
LH: loop header
LB: loop body
LE: loop exit
PB: predicated region body
PF: predicated region fallthrough
CT: control target
= control target key end

     0   :  { %s1403_s0 = inlined_call_operand.vmem [shape: f32[8,1024], index: 0, kind: input, shape index: {}]   ;;  %s1404_s1 = inlined_call_operand.hbm [shape: bf16[1024,128], index: 1, kind: input, shape index: {}]   ;;  %s1405_s2 = inlined_call_operand.vmem [shape: bf16[128,128], index: 2, kind: input, shape index: {}]   ;;  %s1406_s3 = inlined_call_operand.<no memory space> [shape: f32[1,1], index: 3, kind: input, shape index: {}]   ;;  %s1407_s4 = inlined_call_operand.vmem [shape: f32[8,128], index: 4, kind: output, shape index: {0}]   ;;  %s1408_s5 = inlined_call_operand.vmem [shape: f32[8,128], index: 5, kind: output, shape index: {1}]  }
   0x1   :  { %11 = sst [smem:[#allocation3]] %s1406_s3 }
   0x2   :  { %12 = vsyncpa [#allocation5], 0 }
   0x3   :  { %14 = vsyncpa [#allocation5 + $0x1], 0  ;;  %s1244_s20 = smov 0   ;;  %s1246_s21 = smov 0  }
   0x4   :  { %s1248_s22 = smov 0   ;;  %s1250_s23 = smov 0  }
   0x5   :  { %s1252_s24 = smov 0   ;;  %s1254_s25 = smov 0  }
   0x6 LB: > { %s849_s3 = sadd.s32 4294967295, %s1206_s25   ;;  %s29_s26 = sadd.s32 1, %s1202_s24  ;;  %s1206_s25 = sphi %s1254_s25, %s20_s25   ;;  %s1202_s24 = sphi %s1252_s24, %s1415_s24   ;;  %s1198_s23 = sphi %s1250_s23, %s1414_s23   ;;  %s1194_s22 = sphi %s1248_s22, %s1413_s22   ;;  %s1190_s21 = sphi %s1246_s21, %s1412_s21   ;;  %s1186_s20 = sphi %s1244_s20, %s1411_s20  }
   0x7   : > { %p30_p0 = scmp.ge.s32.totalorder %s29_s26, 2  ;;  %s67_s27 = sadd.s32 1, %s1194_s22 }
   0x8   : > { %p74_p1 = scmp.ne.s32.totalorder %s1194_s22, %s1190_s21  ;;  %p75_p2 = scmp.eq.s32.totalorder %s1206_s25, 0 }
   0x9   : > { %s1417_s26 = smov (%p30_p0, %s29_s26), 0  ;;  %p80_p4 = scmp.ne.s32.totalorder %s1190_s21, %s1186_s20 }
   0xa   : > { %p1280_p3 = por %p75_p2, %p74_p1  ;;  %s64_s29 = ssub.s32 %s1202_s24, %s1417_s26 }
   0xb   : > { %p81_p5 = scmp.eq.s32.totalorder %s849_s3, 0  ;;  %p65_p6 = scmp.eq.s32.totalorder %s64_s29, 0 }
   0xc   : > { %p1072_p8 = scmp.lt.s32.totalorder %s1206_s25, 2  ;;  %s217_s7 = sand.u32 1, %s1194_s22  }
   0xd   : > { %p1287_p7 = por %p81_p5, %p80_p4  ;;  %s1025_s8 = sshll.u32 %s1202_s24, 8 }
   0xe   : > { %s1293_s6 = scalar_select %p65_p6, %s1194_s22, %s67_s27  }
   0xf   : > { %s852_s9 = sshll.u32 %s217_s7, 8  ;;  %s226_s12 = scalar_lea.hbm %s1404_s1, %s1025_s8 }
  0x10   : > { %s227_s13 = sshll.u32 %s226_s12, 4  ;;  %s221_s14 = scalar_lea.vmem [#allocation4], %s852_s9  ;;  %s228_s13 = int_to_ptr.hbm [resolvable:$true] %s227_s13 }
  0x11   : > { %s229_s15 = sshll.u32 %s221_s14, 4  ;;  %p1069_p9 = pnand %p1072_p8, %p1280_p3  ;;  %s230_s15 = int_to_ptr.vmem [resolvable:$true] %s229_s15 }
  0x12   : > { %p855_p10 = scmp.ge.s32.totalorder %s1206_s25, 1  ;;  %p237_p11 = scmp.lt.s32.totalorder %s1206_s25, 3 }
  0x13   : > { %s218_s16 = scalar_lea.sflag [#allocation5], %s217_s7  ;;  %s1208_s17 = smov 64  }
  0x14   : > { %s1209_s18 = smov 4   ;;  %p238_p12 = pnand %p855_p10, %p237_p11 }
  0x15   : > { %1071 = dma.hbm_to_vmem [thread:$0]  (!%p1069_p9), %s228_s13, 4096, %s230_s15, %s218_s16, %s1208_s17, %s1208_s17, %s1209_s18  }
  0x16   : > { %241 = sbr.rel (%p238_p12) target bundleno = 493 (0x1ed), region = 36  ;;  %s243_s19 = sand.u32 (!%p238_p12), 1, %s1190_s21  }
  0x17   : > { %s856_s20 = sshll.u32 (!%p238_p12), %s243_s19, 8  ;;  %s244_s3 = scalar_lea.sflag (!%p238_p12), [#allocation5], %s243_s19 }
  0x18   : > { %s1305_s27 = scalar_lea.vmem (!%p238_p12), [#allocation4], %s856_s20 }
  0x1b   : > { %1181 = dma.done.wait (%p1287_p7), %s244_s3, 4096  }
  0x1c   : > { %1183 = vsyncadd (%p1287_p7), %s244_s3, 4294963200  ;;  %s857_s28 = sshll.u32 %s1198_s23, 2  ;;  %p859_p0 = scmp.ne.s32.totalorder %s1198_s23, 0 }
  0x1d   : > { %p290_p13 = scmp.lt.s32.totalorder %s857_s28, 7 }
  0x1e   : > { %309 = sbr.rel (%p859_p0) target bundleno = 37 (0x25), region = 44 }
  0x1f   : > { %s1419_s28 = smov (!%p290_p13, %s857_s28), 7 }
  0x20   : > { %s858_s29 = sshll.u32 %s1419_s28, 3 }
  0x21   : > { %s1315_s9 = scalar_lea.vmem %s1403_s0, %s858_s29 }
  0x23   : > { %v1210_v0 = vmov 0.0  }
  0x24   : > { %310 = vst [vmem:[#allocation2] sm:$0xff] %v1210_v0 }
  0x25 PF: > { %v1033_v1 = vld [vmem:[%s1305_s27 + $0x38] sm:$0xff]  ;;  %v1032_v5 = vld [vmem:[%s1305_s27 + $0x30] sm:$0xff]  ;;  %v1031_v9 = vld [vmem:[%s1305_s27 + $0x28] sm:$0xff]  ;;  %p988_p1 = scmp.ne.s32.totalorder %s1198_s23, 1 }
  0x26   : > { %v1041_v2 = vld [vmem:[%s1305_s27 + $0x78] sm:$0xff]  ;;  %576 = vmatpush.bf16.msra.mxu0 %v1033_v1  ;;  %v1040_v6 = vld [vmem:[%s1305_s27 + $0x70] sm:$0xff]  ;;  %v1039_v10 = vld [vmem:[%s1305_s27 + $0x68] sm:$0xff]  ;;  %s729_s8 = sld [smem:[#allocation3]] (!%p988_p1) }
  0x27   : > { %v1049_v3 = vld [vmem:[%s1305_s27 + $0xb8] sm:$0xff]  ;;  %589 = vmatpush.bf16.msra.mxu1 %v1041_v2  ;;  %v1048_v7 = vld [vmem:[%s1305_s27 + $0xb0] sm:$0xff]  ;;  %v1047_v11 = vld [vmem:[%s1305_s27 + $0xa8] sm:$0xff] }
  0x28   : > { %v1057_v4 = vld [vmem:[%s1305_s27 + $0xf8] sm:$0xff]  ;;  %602 = vmatpush.bf16.msra.mxu2 %v1049_v3  ;;  %v1056_v8 = vld [vmem:[%s1305_s27 + $0xf0] sm:$0xff]  ;;  %v1055_v12 = vld [vmem:[%s1305_s27 + $0xe8] sm:$0xff] }
  0x29   : > { %615 = vmatpush.bf16.msra.mxu3 %v1057_v4  ;;  %v1030_v13 = vld [vmem:[%s1305_s27 + $0x20] sm:$0xff]  ;;  %v1029_v17 = vld [vmem:[%s1305_s27 + $0x18] sm:$0xff]  ;;  %v1028_v21 = vld [vmem:[%s1305_s27 + $0x10] sm:$0xff] }
  0x2a   : > { %577 = vmatpush.bf16.msra.mxu0 %v1032_v5  ;;  %v1038_v14 = vld [vmem:[%s1305_s27 + $0x60] sm:$0xff]  ;;  %v1037_v18 = vld [vmem:[%s1305_s27 + $0x58] sm:$0xff]  ;;  %v1036_v22 = vld [vmem:[%s1305_s27 + $0x50] sm:$0xff] }
  0x2b   : > { %590 = vmatpush.bf16.msra.mxu1 %v1040_v6  ;;  %v1046_v15 = vld [vmem:[%s1305_s27 + $0xa0] sm:$0xff]  ;;  %v1045_v19 = vld [vmem:[%s1305_s27 + $0x98] sm:$0xff]  ;;  %v1044_v23 = vld [vmem:[%s1305_s27 + $0x90] sm:$0xff] }
  0x2c   : > { %603 = vmatpush.bf16.msra.mxu2 %v1048_v7  ;;  %v1054_v16 = vld [vmem:[%s1305_s27 + $0xe0] sm:$0xff]  ;;  %v1053_v20 = vld [vmem:[%s1305_s27 + $0xd8] sm:$0xff]  ;;  %v1052_v24 = vld [vmem:[%s1305_s27 + $0xd0] sm:$0xff] }
  0x2d   : > { %616 = vmatpush.bf16.msra.mxu3 %v1056_v8  ;;  %v1027_v25 = vld [vmem:[%s1305_s27 + $0x8] sm:$0xff]  ;;  %v1026_v29 = vld [vmem:[%s1305_s27] sm:$0xff]  ;;  %v311_v32 = vld [vmem:[%s1315_s9] sm:$0xff] }
  0x2e   : > { %578 = vmatpush.bf16.msra.mxu0 %v1031_v9  ;;  %v1035_v26 = vld [vmem:[%s1305_s27 + $0x48] sm:$0xff]  ;;  %v1034_v30 = vld [vmem:[%s1305_s27 + $0x40] sm:$0xff]  ;;  %v314_v36 = vld [vmem:[%s1315_s9 + $0x18] sm:$0xff]  ;;  %v315_v37 = vpack.c.bf16 %v311_v32, %v311_v32 }
  0x2f   : > { %591 = vmatpush.bf16.msra.mxu1 %v1039_v10  ;;  %v1043_v27 = vld [vmem:[%s1305_s27 + $0x88] sm:$0xff]  ;;  %v1042_v31 = vld [vmem:[%s1305_s27 + $0x80] sm:$0xff]  ;;  %v318_v40 = vpack.c.bf16 %v314_v36, %v314_v36  ;;  %v319_v49 = vld [vmem:[#allocation2] sm:$0xff] }
  0x30   : > { %604 = vmatpush.bf16.msra.mxu2 %v1047_v11  ;;  %v1051_v28 = vld [vmem:[%s1305_s27 + $0xc8] sm:$0xff]  ;;  %v312_v33 = vld [vmem:[%s1315_s9 + $0x8] sm:$0xff] }
  0x31   : > { %617 = vmatpush.bf16.msra.mxu3 %v1055_v12  ;;  %v1050_v34 = vld [vmem:[%s1305_s27 + $0xc0] sm:$0xff]  ;;  %v313_v35 = vld [vmem:[%s1315_s9 + $0x10] sm:$0xff]  ;;  %v316_v38 = vpack.c.bf16 %v312_v33, %v312_v33 }
  0x32   : > { %579 = vmatpush.bf16.msra.mxu0 %v1030_v13  ;;  %v317_v39 = vpack.c.bf16 %v313_v35, %v313_v35 }
  0x33   : > { %592 = vmatpush.bf16.msra.mxu1 %v1038_v14 }
  0x34   : > { %605 = vmatpush.bf16.msra.mxu2 %v1046_v15 }
  0x35   : > { %618 = vmatpush.bf16.msra.mxu3 %v1054_v16 }
  0x36   : > { %580 = vmatpush.bf16.msra.mxu0 %v1029_v17 }
  0x37   : > { %593 = vmatpush.bf16.msra.mxu1 %v1037_v18 }
  0x38   : > { %606 = vmatpush.bf16.msra.mxu2 %v1045_v19 }
  0x39   : > { %619 = vmatpush.bf16.msra.mxu3 %v1053_v20 }
  0x3a   : > { %581 = vmatpush.bf16.msra.mxu0 %v1028_v21 }
  0x3b   : > { %594 = vmatpush.bf16.msra.mxu1 %v1036_v22 }
  0x3c   : > { %607 = vmatpush.bf16.msra.mxu2 %v1044_v23 }
  0x3d   : > { %620 = vmatpush.bf16.msra.mxu3 %v1052_v24 }
  0x3e   : > { %582 = vmatpush.bf16.msra.mxu0 %v1027_v25 }
  0x3f   : > { %595 = vmatpush.bf16.msra.mxu1 %v1035_v26 }
  0x40   : > { %608 = vmatpush.bf16.msra.mxu2 %v1043_v27 }
  0x41   : > { %621 = vmatpush.bf16.msra.mxu3 %v1051_v28 }
  0x42   : > { %583 = vmatpush.bf16.msra.mxu0 %v1026_v29 }
  0x43   : > { %596 = vmatpush.bf16.msra.mxu1 %v1034_v30 }
  0x44   : > { %609 = vmatpush.bf16.msra.mxu2 %v1042_v31 }
  0x45   : > { %622 = vmatpush.bf16.msra.mxu3 %v1050_v34  ;;  %584 = vmatmul.bf16.vlgmr.msra.gmra.mxu0 %v315_v37 }
  0x46   : > { %597 = vmatmul.bf16.vlgmr.msra.gmra.mxu1 %v316_v38 }
  0x47   : > { %610 = vmatmul.bf16.vlgmr.msra.gmra.mxu2 %v317_v39 }
  0x48   : > { %623 = vmatmul.bf16.vlgmr.msra.gmra.mxu3 %v318_v40 }
  0xc2   : > { %v585_v41 = vpop.f32.mrf.mxu0 }
  0xc3   : > { %v598_v42 = vpop.f32.mrf.mxu1 }
  0xc4   : > { %v599_v43 = vadd.f32 %v598_v42, %v585_v41 }
  0xca   : > { %v611_v44 = vpop.f32.mrf.mxu2  ;;  %v587_v47 = vpop.f32.mrf.mxu0 }
  0xcb   : > { %v624_v45 = vpop.f32.mrf.mxu3  ;;  %v612_v46 = vadd.f32 %v611_v44, %v599_v43  ;;  %v600_v48 = vpop.f32.mrf.mxu1 }
  0xcd   : > { %v625_v50 = vadd.f32 %v624_v45, %v612_v46 }
  0xcf   : > { %v628_v51 = vadd.f32 %v625_v50, %v319_v49  ;;  %633 = sbr.rel (%p988_p1) target bundleno = 493 (0x1ed), region = 48 }
  0xd1   : > { %629 = vst [vmem:[#allocation2] sm:$0xff] %v628_v51 }
  0xd2   : > { %v613_v52 = vpop.f32.mrf.mxu2 }
  0xd3   : > { %v626_v53 = vpop.f32.mrf.mxu3 }
  0xd4   : > { %v1065_v55 = vld [vmem:[%s1405_s2 + $0x38] sm:$0xff]  ;;  %v1064_v57 = vld [vmem:[%s1405_s2 + $0x30] sm:$0xff]  ;;  %v1063_v58 = vld [vmem:[%s1405_s2 + $0x28] sm:$0xff]  ;;  %v730_v11 = vstv %s729_s8 }
  0xd5   : > { %716 = vmatpush.bf16.msra.mxu0 %v1065_v55  ;;  %v1062_v59 = vld [vmem:[%s1405_s2 + $0x20] sm:$0xff]  ;;  %v1061_v60 = vld [vmem:[%s1405_s2 + $0x18] sm:$0xff]  ;;  %v1060_v61 = vld [vmem:[%s1405_s2 + $0x10] sm:$0xff] }
  0xd6   : > { %v1059_v62 = vld [vmem:[%s1405_s2 + $0x8] sm:$0xff]  ;;  %v1058_v63 = vld [vmem:[%s1405_s2] sm:$0xff] }
  0xd8   : > { %v634_v54 = vld [vmem:[#allocation2] sm:$0xff] }
  0xd9   : > { %v635_v56 = vmul.f32 %v634_v54, %v634_v54  ;;  %717 = vmatpush.bf16.msra.mxu0 %v1064_v57 }
  0xdb   : > { %636 = vadd.xlane.f32.xlu0 %v635_v56 }
  0xdd   : > { %718 = vmatpush.bf16.msra.mxu0 %v1063_v58 }
  0xe1   : > { %719 = vmatpush.bf16.msra.mxu0 %v1062_v59 }
  0xe5   : > { %720 = vmatpush.bf16.msra.mxu0 %v1061_v60 }
  0xe9   : > { %721 = vmatpush.bf16.msra.mxu0 %v1060_v61 }
  0xed   : > { %722 = vmatpush.bf16.msra.mxu0 %v1059_v62 }
  0xf1   : > { %723 = vmatpush.bf16.msra.mxu0 %v1058_v63 }
 0x14e   : > { %v637_v0 = vpop.xlane.xlu0 %636 }
 0x14f   : > { %v638_v1 = vmax.f32 %v637_v0, 1e-12 }
 0x151   : > { %1124 = vrsqrt.f32 %v638_v1  ;;  %vm645_vm1 = vweird.f32 %v638_v1 }
 0x157   : > { %v1125_v2 = vpop.eup %1124 }
 0x158   : > { %v640_v3 = vmul.f32 %v1125_v2, %v638_v1  ;;  %vm646_vm0 = vweird.f32 %v1125_v2 }
 0x159   : > { %vm647_vm2 = vmor %vm645_vm1, %vm646_vm0 }
 0x15a   : > { %v641_v4 = vmul.f32 %v1125_v2, %v640_v3 }
 0x15c   : > { %v642_v5 = vmul.f32 0.5, %v641_v4 }
 0x15e   : > { %v643_v6 = vsub.f32 1.5, %v642_v5 }
 0x160   : > { %v644_v7 = vmul.f32 %v1125_v2, %v643_v6 }
 0x162   : > { %v648_v8 = vsel %vm647_vm2, %v1125_v2, %v644_v7 }
 0x163   : > { %v649_v9 = vmul.f32 %v648_v8, %v634_v54 }
 0x165   : > { %650 = vst [vmem:[%s1408_s5] sm:$0xff] %v649_v9  ;;  %v651_v10 = vpack.c.bf16 %v649_v9, %v649_v9 }
 0x167   : > { %724 = vmatmul.bf16.vlgmr.msra.gmra.mxu0 %v651_v10 }
 0x1e4   : > { %v725_v12 = vpop.f32.mrf.mxu0 }
 0x1e5   : > { %v731_v13 = vmul.f32 %v730_v11, %v725_v12 }
 0x1e7   : > { %732 = vst [vmem:[%s1407_s4] sm:$0xff] %v731_v13 }
 0x1ec   : > { %v727_v14 = vpop.f32.mrf.mxu0 }
 0x1ed PF: > { %s20_s25 = sadd.s32 1, %s1206_s25   ;;  %s1411_s20 = smov %s1190_s21 }
 0x1ee   : > { %p17_p2 = scmp.ge.s32.totalorder %s20_s25, 4   ;;  %s1412_s21 = smov %s1194_s22 }
 0x1ef   : > { %s1413_s22 = smov %s1293_s6  ;;  %s1414_s23 = smov %s1202_s24 }
 0x1f0   : > { %s1415_s24 = smov %s1417_s26  ;;  %19 = sbr.rel (!%p17_p2) target bundleno = 6 (0x6), region = 99 }
 0x1f5   :  { %766 = vsyncpa [#allocation5], 1 }
 0x1f6   :  { %768 = vsyncpa [#allocation5 + $0x1], 1 }

</bundles_post_ra>
